<compile_context>
chip_gen: v5e
topology: v5e:2x2
jax: 0.10.0
libtpu: 0.0.40
codegen_flags: <defaults>
</compile_context>

<pallas_src>
import functools

import jax
import jax.numpy as jnp
from jax.experimental import pallas as pl
from jax.experimental.pallas import tpu as pltpu


def _round_up(n, m):
    return -(-n // m) * m


# ------------------------------------------------------------------
# Fused Pallas kernel
# ------------------------------------------------------------------
def _make_fused_tcn_kernel(B, L, k, dilation_base, num_layers, has_conv3,
                           C, W):
    """Build the fused TCN forward kernel.

    Ref order:
      x        (B, L, C)              f32   channels-last, channel-padded to C
      conv_w   (2*num_layers, k*C, C) bf16  im2col-reshaped conv weights
      [res_w   (n3, C, C)             bf16] 1x1 residual conv weights (if any)
      fc_w     (3, C, W)              bf16  fc1/fc2/fc3 weights, lane-padded
      bias     (n_bias, 1, W)         f32   all biases, lane-padded to W
      o_ref    (B, W)                 f32   lane-dense output slab
    """
    BL = B * L
    n3 = sum(has_conv3)
    n_conv_b = 2 * num_layers

    def kernel(*refs):
        if n3 > 0:
            x_ref, conv_w_ref, res_w_ref, fc_w_ref, bias_ref, o_ref = refs
        else:
            x_ref, conv_w_ref, fc_w_ref, bias_ref, o_ref = refs
            res_w_ref = None

        # Local-time index of every row of the (B*L, C) activation (hoisted;
        # used to mask rows that roll across the causal left padding / the
        # previous batch element).
        t_local = jax.lax.broadcasted_iota(jnp.int32, (B, L, C), 1)
        t_local = t_local.reshape(BL, C)

        def conv_bias(j):                       # (1, C) f32 view of the slab
            return bias_ref[j][:, :C]

        def causal_conv(x2d, w_bf16, b, dilation, apply_relu):
            """Dilated causal conv as ONE im2col matmul; activations stay in
            vregs (no VMEM scratch round trip).

            x2d: (BL, C) f32; w_bf16: (k*C, C) bf16; b: (1, C) f32."""
            cols = []
            for j in range(k):
                shift = dilation * (k - 1 - j)          # static python int
                if shift == 0:
                    xs = x2d
                else:
                    # out[t] = x[t - shift]; rows with local time < shift are
                    # in the causal pad region (or wrapped from another batch
                    # element) and are masked to zero.
                    rolled = pltpu.roll(x2d, shift, axis=0)
                    xs = jnp.where(t_local >= shift, rolled, 0.0)
                cols.append(xs)
            xcat = jnp.concatenate(cols, axis=-1).astype(jnp.bfloat16)
            acc = jnp.dot(xcat, w_bf16,
                          preferred_element_type=jnp.float32) + b
            if apply_relu:
                acc = jnp.maximum(acc, 0.0)
            return acc

        x2d = x_ref[...].astype(jnp.float32).reshape(BL, C)

        r = 0
        for i in range(num_layers):
            d = dilation_base ** i
            residual = x2d
            # conv1 -> ReLU (dropout = identity in eval mode)
            h = causal_conv(x2d, conv_w_ref[2 * i], conv_bias(2 * i), d,
                            apply_relu=True)
            # conv2 (-> ReLU unless last block) (dropout = identity)
            y = causal_conv(h, conv_w_ref[2 * i + 1], conv_bias(2 * i + 1), d,
                            apply_relu=(i < num_layers - 1))
            # optional 1x1 conv on the residual path (in_dim != out_dim)
            if has_conv3[i]:
                residual = (jnp.dot(residual.astype(jnp.bfloat16),
                                    res_w_ref[r],
                                    preferred_element_type=jnp.float32)
                            + conv_bias(n_conv_b + r))
                r += 1
            x2d = y + residual

        # torch x[:, :, -1] (NCL) == last timestep of each batch element.
        x_last = x2d.reshape(B, L, C)[:, L - 1, :]          # (B, C)
        fb = n_conv_b + n3
        h = jnp.dot(x_last.astype(jnp.bfloat16), fc_w_ref[0],
                    preferred_element_type=jnp.float32) + bias_ref[fb]
        h = jnp.maximum(h, 0.0)
        h = jnp.dot(h[:, :C].astype(jnp.bfloat16), fc_w_ref[1],
                    preferred_element_type=jnp.float32) + bias_ref[fb + 1]
        h = jnp.maximum(h, 0.0)
        out = jnp.dot(h[:, :C].astype(jnp.bfloat16), fc_w_ref[2],
                      preferred_element_type=jnp.float32) + bias_ref[fb + 2]
        o_ref[...] = out.astype(o_ref.dtype)

    return kernel


# ------------------------------------------------------------------
# Wrapper: one pallas_call for the whole forward pass
# ------------------------------------------------------------------
def tcn_forward(x_ncl, params, *, kernel_size, num_layers, dilation_base,
                num_filters, fin_dim, predict_window):
    B, Cin, L = x_ncl.shape
    C = num_filters
    O = fin_dim * predict_window
    k = kernel_size
    # Lane-dense width for the MLP-head weights / biases / output slab.
    W = max(_round_up(C, 128), _round_up(O, 128))

    # NCL -> NLC at the boundary; zero-pad channels to C so every in-kernel
    # matmul has a uniform lane width.
    x = jnp.transpose(x_ncl, (0, 2, 1)).astype(jnp.float32)
    if Cin < C:
        x = jnp.pad(x, ((0, 0), (0, 0), (0, C - Cin)))

    def conv_w_slab(w):        # (k, cin, C) -> (k*C, C), zero-padded cin rows
        cin = w.shape[1]
        if cin < C:
            w = jnp.pad(w, ((0, 0), (0, C - cin), (0, 0)))
        return w.reshape(k * C, C)

    def pad_lanes(v, width):   # 1-D bias -> (1, width)
        v = v.reshape(1, -1)
        return jnp.pad(v, ((0, 0), (0, width - v.shape[-1])))

    def pad_fc(wmat):          # (C, n) -> (C, W)
        return jnp.pad(wmat, ((0, 0), (0, W - wmat.shape[1])))

    conv_ws, res_ws, biases, res_biases, has_conv3 = [], [], [], [], []
    for bp in params["blocks"]:
        conv_ws += [conv_w_slab(bp["w1"]), conv_w_slab(bp["w2"])]
        biases += [pad_lanes(bp["b1"], W), pad_lanes(bp["b2"], W)]
        if "w3" in bp:
            has_conv3.append(True)
            w3 = bp["w3"]                          # (1, cin, C)
            cin = w3.shape[1]
            if cin < C:
                w3 = jnp.pad(w3, ((0, 0), (0, C - cin), (0, 0)))
            res_ws.append(w3.reshape(C, C))
            res_biases.append(pad_lanes(bp["b3"], W))
        else:
            has_conv3.append(False)
    biases += res_biases

    fc_w = jnp.stack([pad_fc(params["fc1_w"]), pad_fc(params["fc2_w"]),
                      pad_fc(params["fc3_w"])]).astype(jnp.bfloat16)
    biases += [pad_lanes(params["fc1_b"], W), pad_lanes(params["fc2_b"], W),
               pad_lanes(params["fc3_b"], W)]

    conv_w = jnp.stack(conv_ws).astype(jnp.bfloat16)      # (2*num_layers,k*C,C)
    bias = jnp.stack(biases).astype(jnp.float32)          # (n_bias, 1, W)

    args = [x, conv_w]
    if res_ws:
        args.append(jnp.stack(res_ws).astype(jnp.bfloat16))   # (n3, C, C)
    args += [fc_w, bias]

    kernel = _make_fused_tcn_kernel(B, L, k, dilation_base, num_layers,
                                    tuple(has_conv3), C, W)

    in_specs = [pl.BlockSpec(a.shape, lambda i, nd=a.ndim: (0,) * nd)
                for a in args]

    out = pl.pallas_call(
        kernel,
        out_shape=jax.ShapeDtypeStruct((B, W), jnp.float32),
        grid_spec=pltpu.PrefetchScalarGridSpec(
            num_scalar_prefetch=0,
            grid=(1,),
            in_specs=in_specs,
            out_specs=pl.BlockSpec((B, W), lambda i: (0, 0)),
        ),
        compiler_params=pltpu.CompilerParams(
            dimension_semantics=("arbitrary",)),
    )(*args)
    # Slice the real output columns back out of the lane-dense slab.
    return out[:, :O].reshape(B, fin_dim, predict_window)


# ------------------------------------------------------------------
# Parameter construction (deterministic, kaiming-normal style)
# ------------------------------------------------------------------
def _kaiming_conv(key, k, cin, cout):
    # torch weight (cout, cin, k), fan_in = cin*k, gain = sqrt(2); stored (k, cin, cout)
    std = (2.0 / (cin * k)) ** 0.5
    return jax.random.normal(key, (k, cin, cout), jnp.float32) * std


def _kaiming_linear(key, fin, fout):
    std = (2.0 / fin) ** 0.5
    return jax.random.normal(key, (fin, fout), jnp.float32) * std


def init_tcn_params(key, input_size, kernel_size, num_filters, num_layers,
                    target_size, fin_dim, predict_window):
    params = {"blocks": []}
    keys = jax.random.split(key, num_layers * 6 + 6)
    ki = 0
    for i in range(num_layers):
        in_dim = input_size if i == 0 else num_filters
        out_dim = target_size if i == num_layers - 1 else num_filters
        bp = {
            "w1": _kaiming_conv(keys[ki], kernel_size, in_dim, num_filters),
            "b1": 0.01 * jax.random.normal(keys[ki + 1], (num_filters,), jnp.float32),
            "w2": _kaiming_conv(keys[ki + 2], kernel_size, num_filters, out_dim),
            "b2": 0.01 * jax.random.normal(keys[ki + 3], (out_dim,), jnp.float32),
        }
        if in_dim != out_dim:
            bp["w3"] = _kaiming_conv(keys[ki + 4], 1, in_dim, out_dim)
            bp["b3"] = 0.01 * jax.random.normal(keys[ki + 5], (out_dim,), jnp.float32)
        ki += 6
        params["blocks"].append(bp)

    params["fc1_w"] = _kaiming_linear(keys[ki], num_filters, num_filters)
    params["fc1_b"] = 0.01 * jax.random.normal(keys[ki + 1], (num_filters,), jnp.float32)
    params["fc2_w"] = _kaiming_linear(keys[ki + 2], num_filters, num_filters)
    params["fc2_b"] = 0.01 * jax.random.normal(keys[ki + 3], (num_filters,), jnp.float32)
    params["fc3_w"] = _kaiming_linear(keys[ki + 4], num_filters,
                                      fin_dim * predict_window)
    params["fc3_b"] = 0.01 * jax.random.normal(keys[ki + 5],
                                               (fin_dim * predict_window,),
                                               jnp.float32)
    return params


# ------------------------------------------------------------------
# Main
# ------------------------------------------------------------------
if __name__ == "__main__":
    # Hyperparameters (target_size == num_filters so fc1 shapes line up,
    # exactly as the PyTorch forward requires).
    input_size = 4
    kernel_size = 3
    num_filters = 32
    num_layers = 2
    dilation_base = 2
    target_size = 32
    fin_dim = 4
    predict_window = 8

    B, L = 2, 16

    assert target_size == num_filters, "fc1 requires target_size == num_filters"
    assert input_size <= num_filters, "channel padding assumes input_size <= num_filters"

    key = jax.random.PRNGKey(0)
    pkey, xkey = jax.random.split(key)
    params = init_tcn_params(pkey, input_size, kernel_size, num_filters,
                             num_layers, target_size, fin_dim, predict_window)

    # PyTorch-style NCL input: (batch, channels, length)
    x = jax.random.normal(xkey, (B, input_size, L), jnp.float32)

    fwd = functools.partial(tcn_forward,
                            kernel_size=kernel_size, num_layers=num_layers,
                            dilation_base=dilation_base,
                            num_filters=num_filters, fin_dim=fin_dim,
                            predict_window=predict_window)
    out = jax.jit(fwd)(x, params)
    out = jax.block_until_ready(out)

    assert out.shape == (B, fin_dim, predict_window), out.shape
    assert bool(jnp.all(jnp.isfinite(out)))
    print("KERNEL_OK")
</pallas_src>

<mosaic_0001>
module attributes {stable_mosaic.version = 11 : i64} {
  func.func @kernel(%arg0: i32, %arg1: memref<2x16x32xf32, #tpu.memory_space<vmem>>, %arg2: memref<4x96x32xbf16, #tpu.memory_space<vmem>>, %arg3: memref<1x32x32xbf16, #tpu.memory_space<vmem>>, %arg4: memref<3x32x128xbf16, #tpu.memory_space<vmem>>, %arg5: memref<8x1x128xf32, #tpu.memory_space<vmem>>, %arg6: memref<2x128xf32, #tpu.memory_space<vmem>>) attributes {dimension_semantics = [#tpu.dimension_semantics<arbitrary>], iteration_bounds = array<i64: 1>, scalar_prefetch = 0 : i64, scratch_operands = 0 : i64, tpu.core_type = #tpu.core_type<tc>, window_params = [{pipeline_mode = #tpu.pipeline_mode<synchronous>, transform_indices = @transform_0, window_bounds = array<i64: 2, 16, 32>}, {pipeline_mode = #tpu.pipeline_mode<synchronous>, transform_indices = @transform_1, window_bounds = array<i64: 4, 96, 32>}, {pipeline_mode = #tpu.pipeline_mode<synchronous>, transform_indices = @transform_2, window_bounds = array<i64: 1, 32, 32>}, {pipeline_mode = #tpu.pipeline_mode<synchronous>, transform_indices = @transform_3, window_bounds = array<i64: 3, 32, 128>}, {pipeline_mode = #tpu.pipeline_mode<synchronous>, transform_indices = @transform_4, window_bounds = array<i64: 8, 1, 128>}, {pipeline_mode = #tpu.pipeline_mode<synchronous>, transform_indices = @transform_5, window_bounds = array<i64: 2, 128>}]} {
    %0 = tpu.iota {dimensions = array<i32: 1>} : vector<2x16x32xi32>
    %1 = vector.shape_cast %0 : vector<2x16x32xi32> to vector<32x32xi32>
    %c0 = arith.constant 0 : index
    %c0_0 = arith.constant 0 : index
    %c0_1 = arith.constant 0 : index
    %2 = vector.load %arg1[%c0, %c0_0, %c0_1] : memref<2x16x32xf32, #tpu.memory_space<vmem>>, vector<2x16x32xf32>
    %3 = vector.shape_cast %2 : vector<2x16x32xf32> to vector<32x32xf32>
    %c0_2 = arith.constant 0 : index
    %c0_3 = arith.constant 0 : index
    %c0_4 = arith.constant 0 : index
    %4 = vector.load %arg2[%c0_2, %c0_3, %c0_4] : memref<4x96x32xbf16, #tpu.memory_space<vmem>>, vector<1x96x32xbf16>
    %5 = vector.shape_cast %4 : vector<1x96x32xbf16> to vector<96x32xbf16>
    %c0_5 = arith.constant 0 : index
    %c0_6 = arith.constant 0 : index
    %c0_7 = arith.constant 0 : index
    %6 = vector.load %arg5[%c0_5, %c0_6, %c0_7] : memref<8x1x128xf32, #tpu.memory_space<vmem>>, vector<1x1x128xf32>
    %7 = vector.shape_cast %6 : vector<1x1x128xf32> to vector<1x128xf32>
    %8 = vector.extract_strided_slice %7 {offsets = [0, 0], sizes = [1, 32], strides = [1, 1]} : vector<1x128xf32> to vector<1x32xf32>
    %c2_i32 = arith.constant 2 : i32
    %9 = tpu.dynamic_rotate %3 by %c2_i32 dim 0 : vector<32x32xf32>, i32 -> vector<32x32xf32>
    %c2_i32_8 = arith.constant 2 : i32
    %10 = vector.broadcast %c2_i32_8 : i32 to vector<32x32xi32>
    %11 = arith.cmpi sge, %1, %10 : vector<32x32xi32>
    %cst = arith.constant 0.000000e+00 : f32
    %12 = vector.broadcast %cst : f32 to vector<32x32xf32>
    %13 = arith.select %11, %9, %12 : vector<32x32xi1>, vector<32x32xf32>
    %c1_i32 = arith.constant 1 : i32
    %14 = tpu.dynamic_rotate %3 by %c1_i32 dim 0 : vector<32x32xf32>, i32 -> vector<32x32xf32>
    %c1_i32_9 = arith.constant 1 : i32
    %15 = vector.broadcast %c1_i32_9 : i32 to vector<32x32xi32>
    %16 = arith.cmpi sge, %1, %15 : vector<32x32xi32>
    %cst_10 = arith.constant 0.000000e+00 : f32
    %17 = vector.broadcast %cst_10 : f32 to vector<32x32xf32>
    %18 = arith.select %16, %14, %17 : vector<32x32xi1>, vector<32x32xf32>
    %19 = tpu.concatenate %13, %18, %3 in 1 : vector<32x32xf32>, vector<32x32xf32>, vector<32x32xf32> -> vector<32x96xf32>
    %20 = arith.truncf %19 : vector<32x96xf32> to vector<32x96xbf16>
    %cst_11 = arith.constant dense<0.000000e+00> : vector<32x32xf32>
    %21 = tpu.matmul %20, %5, %cst_11 {dimension_numbers = #tpu.dot_dimension_numbers<[1], [0], [0], [1], [0, 0, 1, 1], [], []>} : vector<32x96xbf16>, vector<96x32xbf16>, vector<32x32xf32> -> vector<32x32xf32>
    %22 = vector.broadcast %8 : vector<1x32xf32> to vector<32x32xf32>
    %23 = arith.addf %21, %22 : vector<32x32xf32>
    %cst_12 = arith.constant 0.000000e+00 : f32
    %24 = vector.broadcast %cst_12 : f32 to vector<32x32xf32>
    %25 = arith.maximumf %23, %24 : vector<32x32xf32>
    %c1 = arith.constant 1 : index
    %c0_13 = arith.constant 0 : index
    %c0_14 = arith.constant 0 : index
    %26 = vector.load %arg2[%c1, %c0_13, %c0_14] : memref<4x96x32xbf16, #tpu.memory_space<vmem>>, vector<1x96x32xbf16>
    %27 = vector.shape_cast %26 : vector<1x96x32xbf16> to vector<96x32xbf16>
    %c1_15 = arith.constant 1 : index
    %c0_16 = arith.constant 0 : index
    %c0_17 = arith.constant 0 : index
    %28 = vector.load %arg5[%c1_15, %c0_16, %c0_17] : memref<8x1x128xf32, #tpu.memory_space<vmem>>, vector<1x1x128xf32>
    %29 = vector.shape_cast %28 : vector<1x1x128xf32> to vector<1x128xf32>
    %30 = vector.extract_strided_slice %29 {offsets = [0, 0], sizes = [1, 32], strides = [1, 1]} : vector<1x128xf32> to vector<1x32xf32>
    %c2_i32_18 = arith.constant 2 : i32
    %31 = tpu.dynamic_rotate %25 by %c2_i32_18 dim 0 : vector<32x32xf32>, i32 -> vector<32x32xf32>
    %c2_i32_19 = arith.constant 2 : i32
    %32 = vector.broadcast %c2_i32_19 : i32 to vector<32x32xi32>
    %33 = arith.cmpi sge, %1, %32 : vector<32x32xi32>
    %cst_20 = arith.constant 0.000000e+00 : f32
    %34 = vector.broadcast %cst_20 : f32 to vector<32x32xf32>
    %35 = arith.select %33, %31, %34 : vector<32x32xi1>, vector<32x32xf32>
    %c1_i32_21 = arith.constant 1 : i32
    %36 = tpu.dynamic_rotate %25 by %c1_i32_21 dim 0 : vector<32x32xf32>, i32 -> vector<32x32xf32>
    %c1_i32_22 = arith.constant 1 : i32
    %37 = vector.broadcast %c1_i32_22 : i32 to vector<32x32xi32>
    %38 = arith.cmpi sge, %1, %37 : vector<32x32xi32>
    %cst_23 = arith.constant 0.000000e+00 : f32
    %39 = vector.broadcast %cst_23 : f32 to vector<32x32xf32>
    %40 = arith.select %38, %36, %39 : vector<32x32xi1>, vector<32x32xf32>
    %41 = tpu.concatenate %35, %40, %25 in 1 : vector<32x32xf32>, vector<32x32xf32>, vector<32x32xf32> -> vector<32x96xf32>
    %42 = arith.truncf %41 : vector<32x96xf32> to vector<32x96xbf16>
    %cst_24 = arith.constant dense<0.000000e+00> : vector<32x32xf32>
    %43 = tpu.matmul %42, %27, %cst_24 {dimension_numbers = #tpu.dot_dimension_numbers<[1], [0], [0], [1], [0, 0, 1, 1], [], []>} : vector<32x96xbf16>, vector<96x32xbf16>, vector<32x32xf32> -> vector<32x32xf32>
    %44 = vector.broadcast %30 : vector<1x32xf32> to vector<32x32xf32>
    %45 = arith.addf %43, %44 : vector<32x32xf32>
    %cst_25 = arith.constant 0.000000e+00 : f32
    %46 = vector.broadcast %cst_25 : f32 to vector<32x32xf32>
    %47 = arith.maximumf %45, %46 : vector<32x32xf32>
    %48 = arith.truncf %3 : vector<32x32xf32> to vector<32x32xbf16>
    %c0_26 = arith.constant 0 : index
    %c0_27 = arith.constant 0 : index
    %c0_28 = arith.constant 0 : index
    %49 = vector.load %arg3[%c0_26, %c0_27, %c0_28] : memref<1x32x32xbf16, #tpu.memory_space<vmem>>, vector<1x32x32xbf16>
    %50 = vector.shape_cast %49 : vector<1x32x32xbf16> to vector<32x32xbf16>
    %cst_29 = arith.constant dense<0.000000e+00> : vector<32x32xf32>
    %51 = tpu.matmul %48, %50, %cst_29 {dimension_numbers = #tpu.dot_dimension_numbers<[1], [0], [0], [1], [0, 0, 1, 1], [], []>} : vector<32x32xbf16>, vector<32x32xbf16>, vector<32x32xf32> -> vector<32x32xf32>
    %c4 = arith.constant 4 : index
    %c0_30 = arith.constant 0 : index
    %c0_31 = arith.constant 0 : index
    %52 = vector.load %arg5[%c4, %c0_30, %c0_31] : memref<8x1x128xf32, #tpu.memory_space<vmem>>, vector<1x1x128xf32>
    %53 = vector.shape_cast %52 : vector<1x1x128xf32> to vector<1x128xf32>
    %54 = vector.extract_strided_slice %53 {offsets = [0, 0], sizes = [1, 32], strides = [1, 1]} : vector<1x128xf32> to vector<1x32xf32>
    %55 = vector.broadcast %54 : vector<1x32xf32> to vector<32x32xf32>
    %56 = arith.addf %51, %55 : vector<32x32xf32>
    %57 = arith.addf %47, %56 : vector<32x32xf32>
    %c2 = arith.constant 2 : index
    %c0_32 = arith.constant 0 : index
    %c0_33 = arith.constant 0 : index
    %58 = vector.load %arg2[%c2, %c0_32, %c0_33] : memref<4x96x32xbf16, #tpu.memory_space<vmem>>, vector<1x96x32xbf16>
    %59 = vector.shape_cast %58 : vector<1x96x32xbf16> to vector<96x32xbf16>
    %c2_34 = arith.constant 2 : index
    %c0_35 = arith.constant 0 : index
    %c0_36 = arith.constant 0 : index
    %60 = vector.load %arg5[%c2_34, %c0_35, %c0_36] : memref<8x1x128xf32, #tpu.memory_space<vmem>>, vector<1x1x128xf32>
    %61 = vector.shape_cast %60 : vector<1x1x128xf32> to vector<1x128xf32>
    %62 = vector.extract_strided_slice %61 {offsets = [0, 0], sizes = [1, 32], strides = [1, 1]} : vector<1x128xf32> to vector<1x32xf32>
    %c4_i32 = arith.constant 4 : i32
    %63 = tpu.dynamic_rotate %57 by %c4_i32 dim 0 : vector<32x32xf32>, i32 -> vector<32x32xf32>
    %c4_i32_37 = arith.constant 4 : i32
    %64 = vector.broadcast %c4_i32_37 : i32 to vector<32x32xi32>
    %65 = arith.cmpi sge, %1, %64 : vector<32x32xi32>
    %cst_38 = arith.constant 0.000000e+00 : f32
    %66 = vector.broadcast %cst_38 : f32 to vector<32x32xf32>
    %67 = arith.select %65, %63, %66 : vector<32x32xi1>, vector<32x32xf32>
    %c2_i32_39 = arith.constant 2 : i32
    %68 = tpu.dynamic_rotate %57 by %c2_i32_39 dim 0 : vector<32x32xf32>, i32 -> vector<32x32xf32>
    %c2_i32_40 = arith.constant 2 : i32
    %69 = vector.broadcast %c2_i32_40 : i32 to vector<32x32xi32>
    %70 = arith.cmpi sge, %1, %69 : vector<32x32xi32>
    %cst_41 = arith.constant 0.000000e+00 : f32
    %71 = vector.broadcast %cst_41 : f32 to vector<32x32xf32>
    %72 = arith.select %70, %68, %71 : vector<32x32xi1>, vector<32x32xf32>
    %73 = tpu.concatenate %67, %72, %57 in 1 : vector<32x32xf32>, vector<32x32xf32>, vector<32x32xf32> -> vector<32x96xf32>
    %74 = arith.truncf %73 : vector<32x96xf32> to vector<32x96xbf16>
    %cst_42 = arith.constant dense<0.000000e+00> : vector<32x32xf32>
    %75 = tpu.matmul %74, %59, %cst_42 {dimension_numbers = #tpu.dot_dimension_numbers<[1], [0], [0], [1], [0, 0, 1, 1], [], []>} : vector<32x96xbf16>, vector<96x32xbf16>, vector<32x32xf32> -> vector<32x32xf32>
    %76 = vector.broadcast %62 : vector<1x32xf32> to vector<32x32xf32>
    %77 = arith.addf %75, %76 : vector<32x32xf32>
    %cst_43 = arith.constant 0.000000e+00 : f32
    %78 = vector.broadcast %cst_43 : f32 to vector<32x32xf32>
    %79 = arith.maximumf %77, %78 : vector<32x32xf32>
    %c3 = arith.constant 3 : index
    %c0_44 = arith.constant 0 : index
    %c0_45 = arith.constant 0 : index
    %80 = vector.load %arg2[%c3, %c0_44, %c0_45] : memref<4x96x32xbf16, #tpu.memory_space<vmem>>, vector<1x96x32xbf16>
    %81 = vector.shape_cast %80 : vector<1x96x32xbf16> to vector<96x32xbf16>
    %c3_46 = arith.constant 3 : index
    %c0_47 = arith.constant 0 : index
    %c0_48 = arith.constant 0 : index
    %82 = vector.load %arg5[%c3_46, %c0_47, %c0_48] : memref<8x1x128xf32, #tpu.memory_space<vmem>>, vector<1x1x128xf32>
    %83 = vector.shape_cast %82 : vector<1x1x128xf32> to vector<1x128xf32>
    %84 = vector.extract_strided_slice %83 {offsets = [0, 0], sizes = [1, 32], strides = [1, 1]} : vector<1x128xf32> to vector<1x32xf32>
    %c4_i32_49 = arith.constant 4 : i32
    %85 = tpu.dynamic_rotate %79 by %c4_i32_49 dim 0 : vector<32x32xf32>, i32 -> vector<32x32xf32>
    %c4_i32_50 = arith.constant 4 : i32
    %86 = vector.broadcast %c4_i32_50 : i32 to vector<32x32xi32>
    %87 = arith.cmpi sge, %1, %86 : vector<32x32xi32>
    %cst_51 = arith.constant 0.000000e+00 : f32
    %88 = vector.broadcast %cst_51 : f32 to vector<32x32xf32>
    %89 = arith.select %87, %85, %88 : vector<32x32xi1>, vector<32x32xf32>
    %c2_i32_52 = arith.constant 2 : i32
    %90 = tpu.dynamic_rotate %79 by %c2_i32_52 dim 0 : vector<32x32xf32>, i32 -> vector<32x32xf32>
    %c2_i32_53 = arith.constant 2 : i32
    %91 = vector.broadcast %c2_i32_53 : i32 to vector<32x32xi32>
    %92 = arith.cmpi sge, %1, %91 : vector<32x32xi32>
    %cst_54 = arith.constant 0.000000e+00 : f32
    %93 = vector.broadcast %cst_54 : f32 to vector<32x32xf32>
    %94 = arith.select %92, %90, %93 : vector<32x32xi1>, vector<32x32xf32>
    %95 = tpu.concatenate %89, %94, %79 in 1 : vector<32x32xf32>, vector<32x32xf32>, vector<32x32xf32> -> vector<32x96xf32>
    %96 = arith.truncf %95 : vector<32x96xf32> to vector<32x96xbf16>
    %cst_55 = arith.constant dense<0.000000e+00> : vector<32x32xf32>
    %97 = tpu.matmul %96, %81, %cst_55 {dimension_numbers = #tpu.dot_dimension_numbers<[1], [0], [0], [1], [0, 0, 1, 1], [], []>} : vector<32x96xbf16>, vector<96x32xbf16>, vector<32x32xf32> -> vector<32x32xf32>
    %98 = vector.broadcast %84 : vector<1x32xf32> to vector<32x32xf32>
    %99 = arith.addf %97, %98 : vector<32x32xf32>
    %100 = arith.addf %99, %57 : vector<32x32xf32>
    %101 = vector.shape_cast %100 : vector<32x32xf32> to vector<2x16x32xf32>
    %102 = vector.extract_strided_slice %101 {offsets = [0, 15, 0], sizes = [2, 1, 32], strides = [1, 1, 1]} : vector<2x16x32xf32> to vector<2x1x32xf32>
    %103 = vector.shape_cast %102 : vector<2x1x32xf32> to vector<2x32xf32>
    %104 = arith.truncf %103 : vector<2x32xf32> to vector<2x32xbf16>
    %c0_56 = arith.constant 0 : index
    %c0_57 = arith.constant 0 : index
    %c0_58 = arith.constant 0 : index
    %105 = vector.load %arg4[%c0_56, %c0_57, %c0_58] : memref<3x32x128xbf16, #tpu.memory_space<vmem>>, vector<1x32x128xbf16>
    %106 = vector.shape_cast %105 : vector<1x32x128xbf16> to vector<32x128xbf16>
    %cst_59 = arith.constant dense<0.000000e+00> : vector<2x128xf32>
    %107 = tpu.matmul %104, %106, %cst_59 {dimension_numbers = #tpu.dot_dimension_numbers<[1], [0], [0], [1], [0, 0, 1, 1], [], []>} : vector<2x32xbf16>, vector<32x128xbf16>, vector<2x128xf32> -> vector<2x128xf32>
    %c5 = arith.constant 5 : index
    %c0_60 = arith.constant 0 : index
    %c0_61 = arith.constant 0 : index
    %108 = vector.load %arg5[%c5, %c0_60, %c0_61] : memref<8x1x128xf32, #tpu.memory_space<vmem>>, vector<1x1x128xf32>
    %109 = vector.shape_cast %108 : vector<1x1x128xf32> to vector<1x128xf32>
    %110 = vector.broadcast %109 : vector<1x128xf32> to vector<2x128xf32>
    %111 = arith.addf %107, %110 : vector<2x128xf32>
    %cst_62 = arith.constant 0.000000e+00 : f32
    %112 = vector.broadcast %cst_62 : f32 to vector<2x128xf32>
    %113 = arith.maximumf %111, %112 : vector<2x128xf32>
    %114 = vector.extract_strided_slice %113 {offsets = [0, 0], sizes = [2, 32], strides = [1, 1]} : vector<2x128xf32> to vector<2x32xf32>
    %115 = arith.truncf %114 : vector<2x32xf32> to vector<2x32xbf16>
    %c1_63 = arith.constant 1 : index
    %c0_64 = arith.constant 0 : index
    %c0_65 = arith.constant 0 : index
    %116 = vector.load %arg4[%c1_63, %c0_64, %c0_65] : memref<3x32x128xbf16, #tpu.memory_space<vmem>>, vector<1x32x128xbf16>
    %117 = vector.shape_cast %116 : vector<1x32x128xbf16> to vector<32x128xbf16>
    %cst_66 = arith.constant dense<0.000000e+00> : vector<2x128xf32>
    %118 = tpu.matmul %115, %117, %cst_66 {dimension_numbers = #tpu.dot_dimension_numbers<[1], [0], [0], [1], [0, 0, 1, 1], [], []>} : vector<2x32xbf16>, vector<32x128xbf16>, vector<2x128xf32> -> vector<2x128xf32>
    %c6 = arith.constant 6 : index
    %c0_67 = arith.constant 0 : index
    %c0_68 = arith.constant 0 : index
    %119 = vector.load %arg5[%c6, %c0_67, %c0_68] : memref<8x1x128xf32, #tpu.memory_space<vmem>>, vector<1x1x128xf32>
    %120 = vector.shape_cast %119 : vector<1x1x128xf32> to vector<1x128xf32>
    %121 = vector.broadcast %120 : vector<1x128xf32> to vector<2x128xf32>
    %122 = arith.addf %118, %121 : vector<2x128xf32>
    %cst_69 = arith.constant 0.000000e+00 : f32
    %123 = vector.broadcast %cst_69 : f32 to vector<2x128xf32>
    %124 = arith.maximumf %122, %123 : vector<2x128xf32>
    %125 = vector.extract_strided_slice %124 {offsets = [0, 0], sizes = [2, 32], strides = [1, 1]} : vector<2x128xf32> to vector<2x32xf32>
    %126 = arith.truncf %125 : vector<2x32xf32> to vector<2x32xbf16>
    %c2_70 = arith.constant 2 : index
    %c0_71 = arith.constant 0 : index
    %c0_72 = arith.constant 0 : index
    %127 = vector.load %arg4[%c2_70, %c0_71, %c0_72] : memref<3x32x128xbf16, #tpu.memory_space<vmem>>, vector<1x32x128xbf16>
    %128 = vector.shape_cast %127 : vector<1x32x128xbf16> to vector<32x128xbf16>
    %cst_73 = arith.constant dense<0.000000e+00> : vector<2x128xf32>
    %129 = tpu.matmul %126, %128, %cst_73 {dimension_numbers = #tpu.dot_dimension_numbers<[1], [0], [0], [1], [0, 0, 1, 1], [], []>} : vector<2x32xbf16>, vector<32x128xbf16>, vector<2x128xf32> -> vector<2x128xf32>
    %c7 = arith.constant 7 : index
    %c0_74 = arith.constant 0 : index
    %c0_75 = arith.constant 0 : index
    %130 = vector.load %arg5[%c7, %c0_74, %c0_75] : memref<8x1x128xf32, #tpu.memory_space<vmem>>, vector<1x1x128xf32>
    %131 = vector.shape_cast %130 : vector<1x1x128xf32> to vector<1x128xf32>
    %132 = vector.broadcast %131 : vector<1x128xf32> to vector<2x128xf32>
    %133 = arith.addf %129, %132 : vector<2x128xf32>
    %c0_76 = arith.constant 0 : index
    %c0_77 = arith.constant 0 : index
    %134 = vector.load %arg6[%c0_76, %c0_77] : memref<2x128xf32, #tpu.memory_space<vmem>>, vector<2x128xf32>
    tpu.vector_store %arg6[%c0_76, %c0_77], %133 {strides = array<i32>} : memref<2x128xf32, #tpu.memory_space<vmem>>, vector<2x128xf32>,
    return
  }
  func.func @transform_0(%arg0: i32) -> (i32, i32, i32) {
    %c0_i32 = arith.constant 0 : i32
    %c0_i32_0 = arith.constant 0 : i32
    %c0_i32_1 = arith.constant 0 : i32
    %c0_i32_2 = arith.constant 0 : i32
    return %c0_i32, %c0_i32_0, %c0_i32_1 : i32, i32, i32
  }
  func.func @transform_1(%arg0: i32) -> (i32, i32, i32) {
    %c0_i32 = arith.constant 0 : i32
    %c0_i32_0 = arith.constant 0 : i32
    %c0_i32_1 = arith.constant 0 : i32
    %c0_i32_2 = arith.constant 0 : i32
    return %c0_i32, %c0_i32_0, %c0_i32_1 : i32, i32, i32
  }
  func.func @transform_2(%arg0: i32) -> (i32, i32, i32) {
    %c0_i32 = arith.constant 0 : i32
    %c0_i32_0 = arith.constant 0 : i32
    %c0_i32_1 = arith.constant 0 : i32
    %c0_i32_2 = arith.constant 0 : i32
    return %c0_i32, %c0_i32_0, %c0_i32_1 : i32, i32, i32
  }
  func.func @transform_3(%arg0: i32) -> (i32, i32, i32) {
    %c0_i32 = arith.constant 0 : i32
    %c0_i32_0 = arith.constant 0 : i32
    %c0_i32_1 = arith.constant 0 : i32
    %c0_i32_2 = arith.constant 0 : i32
    return %c0_i32, %c0_i32_0, %c0_i32_1 : i32, i32, i32
  }
  func.func @transform_4(%arg0: i32) -> (i32, i32, i32) {
    %c0_i32 = arith.constant 0 : i32
    %c0_i32_0 = arith.constant 0 : i32
    %c0_i32_1 = arith.constant 0 : i32
    %c0_i32_2 = arith.constant 0 : i32
    return %c0_i32, %c0_i32_0, %c0_i32_1 : i32, i32, i32
  }
  func.func @transform_5(%arg0: i32) -> (i32, i32) {
    %c0_i32 = arith.constant 0 : i32
    %c0_i32_0 = arith.constant 0 : i32
    %c0_i32_1 = arith.constant 0 : i32
    return %c0_i32, %c0_i32_0 : i32, i32
  }
}

</mosaic_0001>

<bundles_post_ra>
// kernel: tcn_forward.1
= control target key start
LH: loop header
LB: loop body
LE: loop exit
PB: predicated region body
PF: predicated region fallthrough
CT: control target
= control target key end

     0   :  { %v21_v0 = vlaneseq  ;;  %s1129_s6 = smov 32   ;;  %s1130_s7 = smov 64   ;;  %vm103_vm4 = vcmask 261120   ;;  %vm108_vm5 = vcmask 523264   ;;  %vm154_vm6 = vcmask 785408   ;;  %s1497_s0 = inlined_call_operand.vmem [shape: f32[2,16,32], index: 0, kind: input, shape index: {}]   ;;  %s1498_s1 = inlined_call_operand.vmem [shape: bf16[4,96,32], index: 1, kind: input, shape index: {}]   ;;  %s1499_s4 = inlined_call_operand.vmem [shape: f32[8,1,128], index: 4, kind: input, shape index: {}]   ;;  %s1500_s2 = inlined_call_operand.vmem [shape: bf16[1,32,32], index: 2, kind: input, shape index: {}]   ;;  %s1501_s3 = inlined_call_operand.vmem [shape: bf16[3,32,128], index: 3, kind: input, shape index: {}]   ;;  %s1502_s5 = inlined_call_operand.vmem [shape: f32[2,128], index: 5, kind: output, shape index: {}]  }
   0x1   :  { %v1164_v1 = vld [vmem:[%s1497_s0] sm:$0xff]  ;;  %v1169_v2 = vld [vmem:[%s1497_s0 + $0x8] sm:$0xff]  ;;  %v1174_v3 = vld [vmem:[%s1497_s0 + $0x18] sm:$0xff]  ;;  %vm699_vm9 = vcmask 1041409  }
   0x2   :  { %v1176_v4 = vshrl.u32 %v21_v0, 7  ;;  %v56_v5 = vrot.slane %v1164_v1, 7  ;;  %v57_v6 = vrot.slane %v1169_v2, 7  ;;  %v59_v7 = vrot.slane %v1174_v3, 7  ;;  %v1184_v8 = vld [vmem:[%s1497_s0 + $0x10] sm:$0xff]  ;;  %v1012_v9 = vld [vmem:[%s1498_s1 + $0x28] sm:$0xff] }
   0x3   :  { %v58_v10 = vrot.slane %v1184_v8, 7  ;;  %163 = vmatpush.bf16.msra.mxu0 %v1012_v9  ;;  %v1011_v11 = vld [vmem:[%s1498_s1 + $0x20] sm:$0xff]  ;;  %v1010_v20 = vld [vmem:[%s1498_s1 + $0x18] sm:$0xff]  ;;  %v1046_v21 = vpack.i.bf16 %v1169_v2, %v1164_v1  ;;  %v1056_v22 = vpack.i.bf16 %v1174_v3, %v1184_v8  ;;  %v1009_v23 = vld [vmem:[%s1498_s1 + $0x10] sm:$0xff]  ;;  %v44_v26 = vrot.slane %v1174_v3, 6 }
   0x4   :  { %vm60_vm0 = vcmp.lt.s32.totalorder %v1176_v4, 1  ;;  %vm65_vm1 = vcmp.ge.s32.totalorder %v1176_v4, 1  ;;  %v1008_v24 = vld [vmem:[%s1498_s1 + $0x8] sm:$0xff]  ;;  %v1007_v25 = vld [vmem:[%s1498_s1] sm:$0xff]  ;;  %v41_v28 = vrot.slane %v1164_v1, 6  ;;  %vm45_vm2 = vcmp.lt.s32.totalorder %v1176_v4, 2 }
   0x5   :  { %v63_v12 = vsel %vm60_vm0, %v56_v5, %v57_v6  ;;  %v64_v13 = vsel %vm60_vm0, %v59_v7, %v56_v5  ;;  %v61_v14 = vsel %vm60_vm0, %v58_v10, %v59_v7  ;;  %v62_v15 = vsel %vm60_vm0, %v57_v6, %v58_v10  ;;  %v1121_v59 = vld [vmem:[%s1499_s4] ss:$0 sm:$0xff]  ;;  %v1018_v5 = vld [vmem:[%s1498_s1 + $0x58] sm:$0xff]  ;;  %v1020_v6 = vld [vmem:[%s1500_s2 + $0x8] sm:$0xff] }
   0x6   :  { %v67_v16 = vsel %vm65_vm1, %v64_v13, 0.0  ;;  %v69_v17 = vsel %vm65_vm1, %v62_v15, 0.0  ;;  %v42_v29 = vrot.slane %v1169_v2, 6  ;;  %vm50_vm3 = vcmp.ge.s32.totalorder %v1176_v4, 2  ;;  %312 = vmatpush.bf16.msra.mxu1 %v1018_v5  ;;  %v1017_v10 = vld [vmem:[%s1498_s1 + $0x50] sm:$0xff]  ;;  %368 = vmatpush.bf16.msra.mxu2 %v1020_v6  ;;  %v1016_v15 = vld [vmem:[%s1498_s1 + $0x48] sm:$0xff] }
   0x7   :  { %v1041_v18 = vpack.i.bf16 %v63_v12, %v67_v16  ;;  %v1051_v19 = vpack.i.bf16 %v61_v14, %v69_v17  ;;  %164 = vmatpush.bf16.msra.mxu0 %v1011_v11  ;;  %v49_v30 = vsel %vm45_vm2, %v44_v26, %v41_v28  ;;  %v43_v43 = vrot.slane %v1184_v8, 6  ;;  %v1019_v11 = vld [vmem:[%s1500_s2] sm:$0xff] }
   0x8   :  { %v48_v33 = vsel %vm45_vm2, %v41_v28, %v42_v29  ;;  %v52_v34 = vsel %vm50_vm3, %v49_v30, 0.0  ;;  %v1123_v6 = vld [vmem:[%s1499_s4 + $0x1] ss:$0 sm:$0xff]  ;;  %vm404_vm7 = vcmp.lt.s32.totalorder %v1176_v4, 4  ;;  %vm409_vm8 = vcmp.ge.s32.totalorder %v1176_v4, 4 }
   0x9   :  { %1042 = vrot.lane.b32.xlu0 %v1041_v18, %s1129_s6  ;;  %1052 = vrot.lane.b32.xlu1 %v1051_v19, %s1129_s6  ;;  %v47_v45 = vsel %vm45_vm2, %v42_v29, %v43_v43  ;;  %v46_v49 = vsel %vm45_vm2, %v43_v43, %v44_v26  ;;  %v1033_v4 = vld [vmem:[%s1501_s3] sm:$0xff] }
   0xa   :  { %v54_v50 = vsel %vm50_vm3, %v47_v45, 0.0  ;;  %313 = vmatpush.bf16.msra.mxu1 %v1017_v10  ;;  %369 = vmatpush.bf16.msra.mxu2 %v1019_v11 }
   0xb   :  { %165 = vmatpush.bf16.msra.mxu0 %v1010_v20 }
   0xe   :  { %314 = vmatpush.bf16.msra.mxu1 %v1016_v15 }
   0xf   :  { %166 = vmatpush.bf16.msra.mxu0 %v1009_v23 }
  0x11   :  { %1047 = vrot.lane.b32.xlu0 %v1046_v21, %s1130_s7  ;;  %1057 = vrot.lane.b32.xlu1 %v1056_v22, %s1130_s7 }
  0x13   :  { %167 = vmatpush.bf16.msra.mxu0 %v1008_v24 }
  0x17   :  { %168 = vmatpush.bf16.msra.mxu0 %v1007_v25 }
  0x7b   :  { %v1043_v27 = vpop.permute.xlu0 %1042  ;;  %v1053_v36 = vpop.permute.xlu1 %1052 }
  0x7c   :  { %v1045_v31 = vunpack.i.h.bf16 %v1043_v27  ;;  %v1044_v32 = vunpack.i.l.bf16 %v1043_v27  ;;  %v1055_v46 = vunpack.i.h.bf16 %v1053_v36  ;;  %v1054_v47 = vunpack.i.l.bf16 %v1053_v36 }
  0x7e   :  { %v104_v39 = vsel %vm103_vm4, %v52_v34, %v1044_v32  ;;  %v105_v40 = vsel %vm103_vm4, %v48_v33, %v1045_v31  ;;  %v107_v53 = vsel %vm103_vm4, %v46_v49, %v1055_v46  ;;  %v106_v54 = vsel %vm103_vm4, %v54_v50, %v1054_v47 }
  0x83   :  { %v1048_v35 = vpop.permute.xlu0 %1047  ;;  %v1058_v48 = vpop.permute.xlu1 %1057 }
  0x84   :  { %v1050_v37 = vunpack.i.h.bf16 %v1048_v35  ;;  %v1049_v38 = vunpack.i.l.bf16 %v1048_v35  ;;  %v1060_v51 = vunpack.i.h.bf16 %v1058_v48  ;;  %v1059_v52 = vunpack.i.l.bf16 %v1058_v48 }
  0x86   :  { %v109_v41 = vsel %vm108_vm5, %v104_v39, %v1049_v38  ;;  %v110_v42 = vsel %vm108_vm5, %v105_v40, %v1050_v37  ;;  %v111_v55 = vsel %vm108_vm5, %v106_v54, %v1059_v52  ;;  %v112_v56 = vsel %vm108_vm5, %v107_v53, %v1060_v51  ;;  %v1015_v40 = vld [vmem:[%s1498_s1 + $0x40] sm:$0xff] }
  0x87   :  { %v113_v44 = vpack.c.bf16 %v110_v42, %v109_v41  ;;  %v114_v57 = vpack.c.bf16 %v112_v56, %v111_v55  ;;  %v333_v39 = vpack.c.bf16 %v1169_v2, %v1164_v1  ;;  %315 = vmatpush.bf16.msra.mxu1 %v1015_v40  ;;  %v1014_v41 = vld [vmem:[%s1498_s1 + $0x38] sm:$0xff]  ;;  %v1013_v42 = vld [vmem:[%s1498_s1 + $0x30] sm:$0xff]  ;;  %v334_v1 = vpack.c.bf16 %v1174_v3, %v1184_v8 }
  0x89   :  { %839 = vmatmul.msk.bf16.vlgmr.msra.gmra.mxu0 %vm154_vm6, %v113_v44  ;;  %889 = vmatmul.msk.bf16.vlgmr.msra.gmra.mxu2 %vm103_vm4, %v333_v39 }
  0x8b   :  { %316 = vmatpush.bf16.msra.mxu1 %v1014_v41 }
  0x8f   :  { %317 = vmatpush.bf16.msra.mxu1 %v1013_v42 }
  0x99   :  { %840 = vmatmul.msk.bf16.gmra.mxu0 %vm154_vm6, %v114_v57  ;;  %890 = vmatmul.msk.bf16.gmra.mxu2 %vm103_vm4, %v334_v1 }
 0x106   :  { %v170_v58 = vpop.f32.mrf.mxu0 }
 0x107   :  { %v171_v60 = vadd.f32 %v1121_v59, %v170_v58 }
 0x109   :  { %v180_v62 = vmax.f32 %v171_v60, 0.0 }
 0x10b   :  { %v199_v7 = vrot.slane %v180_v62, 6  ;;  %v211_v25 = vrot.slane %v180_v62, 7 }
 0x10e   :  { %v172_v61 = vpop.f32.mrf.mxu0 }
 0x10f   :  { %v173_v63 = vadd.f32 %v1121_v59, %v172_v61 }
 0x111   :  { %v181_v0 = vmax.f32 %v173_v63, 0.0 }
 0x113   :  { %v200_v9 = vrot.slane %v181_v0, 6  ;;  %v212_v21 = vrot.slane %v181_v0, 7  ;;  %v1066_v38 = vpack.i.bf16 %v181_v0, %v180_v62  ;;  %v371_v0 = vpop.f32.mrf.mxu2 }
 0x115   :  { %v205_v12 = vsel %vm45_vm2, %v199_v7, %v200_v9  ;;  %v217_v35 = vsel %vm60_vm0, %v211_v25, %v212_v21 }
 0x116   :  { %v175_v13 = vpop.f32.mrf.mxu0 }
 0x117   :  { %v176_v14 = vadd.f32 %v1121_v59, %v175_v13 }
 0x119   :  { %v182_v16 = vmax.f32 %v176_v14, 0.0 }
 0x11b   :  { %v201_v17 = vrot.slane %v182_v16, 6  ;;  %v213_v18 = vrot.slane %v182_v16, 7 }
 0x11d   :  { %v204_v19 = vsel %vm45_vm2, %v200_v9, %v201_v17  ;;  %v216_v24 = vsel %vm60_vm0, %v212_v21, %v213_v18  ;;  %v1122_v9 = vld [vmem:[%s1499_s4 + $0x4] ss:$0 sm:$0xff] }
 0x11e   :  { %v177_v20 = vpop.f32.mrf.mxu0  ;;  %v221_v29 = vsel %vm65_vm1, %v216_v24, 0.0  ;;  %v209_v58 = vsel %vm50_vm3, %v204_v19, 0.0  ;;  %v1026_v19 = vld [vmem:[%s1498_s1 + $0x88] sm:$0xff] }
 0x11f   :  { %v178_v22 = vadd.f32 %v1121_v59, %v177_v20  ;;  %516 = vmatpush.bf16.msra.mxu3 %v1026_v19 }
 0x121   :  { %v183_v23 = vmax.f32 %v178_v22, 0.0  ;;  %v1025_v22 = vld [vmem:[%s1498_s1 + $0x80] sm:$0xff] }
 0x123   :  { %v202_v26 = vrot.slane %v183_v23, 6  ;;  %v214_v27 = vrot.slane %v183_v23, 7  ;;  %v1076_v28 = vpack.i.bf16 %v183_v23, %v182_v16  ;;  %517 = vmatpush.bf16.msra.mxu3 %v1025_v22  ;;  %v1124_v22 = vld [vmem:[%s1499_s4 + $0x2] ss:$0 sm:$0xff] }
 0x125   :  { %1077 = vrot.lane.b32.xlu1 %v1076_v28, %s1130_s7  ;;  %v215_v30 = vsel %vm60_vm0, %v213_v18, %v214_v27  ;;  %v218_v31 = vsel %vm60_vm0, %v214_v27, %v211_v25  ;;  %v206_v32 = vsel %vm45_vm2, %v202_v26, %v199_v7  ;;  %v203_v33 = vsel %vm45_vm2, %v201_v17, %v202_v26  ;;  %v373_v7 = vpop.f32.mrf.mxu2  ;;  %v1024_v27 = vld [vmem:[%s1498_s1 + $0x78] sm:$0xff] }
 0x126   :  { %v1071_v34 = vpack.i.bf16 %v215_v30, %v221_v29  ;;  %v219_v36 = vsel %vm65_vm1, %v218_v31, 0.0  ;;  %v207_v46 = vsel %vm50_vm3, %v206_v32, 0.0  ;;  %v374_v15 = vadd.f32 %v1122_v9, %v373_v7  ;;  %v1023_v29 = vld [vmem:[%s1498_s1 + $0x70] sm:$0xff] }
 0x127   :  { %v1061_v37 = vpack.i.bf16 %v217_v35, %v219_v36  ;;  %518 = vmatpush.bf16.msra.mxu3 %v1024_v27 }
 0x128   :  { %1072 = vrot.lane.b32.xlu0 %v1071_v34, %s1129_s6 }
 0x129   :  { %1062 = vrot.lane.b32.xlu2 %v1061_v37, %s1129_s6 }
 0x12b   :  { %519 = vmatpush.bf16.msra.mxu3 %v1023_v29 }
 0x12d   :  { %v376_v20 = vpop.f32.mrf.mxu2 }
 0x12e   :  { %v377_v25 = vadd.f32 %v1122_v9, %v376_v20 }
 0x131   :  { %1067 = vrot.lane.b32.xlu2 %v1066_v38, %s1130_s7 }
 0x135   :  { %v378_v30 = vpop.f32.mrf.mxu2 }
 0x136   :  { %v379_v34 = vadd.f32 %v1122_v9, %v378_v30 }
 0x183   :  { %v1063_v2 = vpop.permute.xlu2 %1062 }
 0x184   :  { %v1065_v43 = vunpack.i.h.bf16 %v1063_v2  ;;  %v1064_v44 = vunpack.i.l.bf16 %v1063_v2 }
 0x186   :  { %v255_v49 = vsel %vm103_vm4, %v207_v46, %v1064_v44  ;;  %v256_v50 = vsel %vm103_vm4, %v205_v12, %v1065_v43  ;;  %v372_v12 = vadd.f32 %v1122_v9, %v371_v0 }
 0x18b   :  { %v1068_v45 = vpop.permute.xlu2 %1067 }
 0x18c   :  { %v1070_v47 = vunpack.i.h.bf16 %v1068_v45  ;;  %v1069_v48 = vunpack.i.l.bf16 %v1068_v45 }
 0x18e   :  { %v259_v51 = vsel %vm108_vm5, %v255_v49, %v1069_v48  ;;  %v260_v52 = vsel %vm108_vm5, %v256_v50, %v1070_v47  ;;  %v1022_v47 = vld [vmem:[%s1498_s1 + $0x68] sm:$0xff]  ;;  %v1021_v48 = vld [vmem:[%s1498_s1 + $0x60] sm:$0xff] }
 0x18f   :  { %v263_v3 = vpack.c.bf16 %v260_v52, %v259_v51  ;;  %520 = vmatpush.bf16.msra.mxu3 %v1022_v47 }
 0x191   :  { %878 = vmatmul.msk.bf16.vlgmr.msra.gmra.mxu1 %vm154_vm6, %v263_v3 }
 0x193   :  { %521 = vmatpush.bf16.msra.mxu3 %v1021_v48 }
 0x197   :  { %v1078_v8 = vpop.permute.xlu1 %1077 }
 0x198   :  { %v1080_v56 = vunpack.i.h.bf16 %v1078_v8  ;;  %v1079_v57 = vunpack.i.l.bf16 %v1078_v8 }
 0x19a   :  { %v1073_v53 = vpop.permute.xlu0 %1072 }
 0x19b   :  { %v1075_v54 = vunpack.i.h.bf16 %v1073_v53  ;;  %v1074_v55 = vunpack.i.l.bf16 %v1073_v53 }
 0x19d   :  { %v258_v59 = vsel %vm103_vm4, %v203_v33, %v1075_v54  ;;  %v257_v60 = vsel %vm103_vm4, %v209_v58, %v1074_v55 }
 0x19e   :  { %v261_v61 = vsel %vm108_vm5, %v257_v60, %v1079_v57  ;;  %v262_v62 = vsel %vm108_vm5, %v258_v59, %v1080_v56 }
 0x19f   :  { %v264_v63 = vpack.c.bf16 %v262_v62, %v261_v61 }
 0x1a1   :  { %879 = vmatmul.msk.bf16.gmra.mxu1 %vm154_vm6, %v264_v63 }
 0x20e   :  { %v319_v5 = vpop.f32.mrf.mxu1 }
 0x20f   :  { %v320_v10 = vadd.f32 %v1123_v6, %v319_v5 }
 0x211   :  { %v329_v13 = vmax.f32 %v320_v10, 0.0 }
 0x213   :  { %v381_v17 = vadd.f32 %v372_v12, %v329_v13 }
 0x215   :  { %v415_v39 = vrot.slane %v381_v17, 6  ;;  %v400_v50 = vrot.slane %v381_v17, 4 }
 0x216   :  { %v321_v11 = vpop.f32.mrf.mxu1 }
 0x217   :  { %v322_v14 = vadd.f32 %v1123_v6, %v321_v11 }
 0x219   :  { %v330_v16 = vmax.f32 %v322_v14, 0.0 }
 0x21b   :  { %v1332_v18 = vadd.f32 %v374_v15, %v330_v16 }
 0x21d   :  { %v1086_v21 = vpack.i.bf16 %v1332_v18, %v381_v17  ;;  %v416_v36 = vrot.slane %v1332_v18, 6  ;;  %v401_v52 = vrot.slane %v1332_v18, 4 }
 0x21e   :  { %v324_v23 = vpop.f32.mrf.mxu1 }
 0x21f   :  { %v325_v24 = vadd.f32 %v1123_v6, %v324_v23  ;;  %1087 = vrot.lane.b32.xlu0 %v1086_v21, %s1130_s7  ;;  %v421_v43 = vsel %vm45_vm2, %v415_v39, %v416_v36  ;;  %v407_v55 = vsel %vm404_vm7, %v400_v50, %v401_v52 }
 0x221   :  { %v331_v26 = vmax.f32 %v325_v24, 0.0 }
 0x223   :  { %v383_v28 = vadd.f32 %v377_v25, %v331_v26 }
 0x225   :  { %v417_v33 = vrot.slane %v383_v28, 6  ;;  %v402_v0 = vrot.slane %v383_v28, 4 }
 0x226   :  { %v326_v31 = vpop.f32.mrf.mxu1 }
 0x227   :  { %v327_v32 = vadd.f32 %v1123_v6, %v326_v31  ;;  %v420_v38 = vsel %vm45_vm2, %v416_v36, %v417_v33  ;;  %v406_v6 = vsel %vm404_vm7, %v401_v52, %v402_v0  ;;  %v1032_v31 = vld [vmem:[%s1498_s1 + $0xb8] sm:$0xff] }
 0x228   :  { %v425_v42 = vsel %vm50_vm3, %v420_v38, 0.0  ;;  %v413_v14 = vsel %vm409_vm8, %v406_v6, 0.0  ;;  %665 = vmatpush.bf16.msrb.mxu2 %v1032_v31 }
 0x229   :  { %v332_v35 = vmax.f32 %v327_v32, 0.0 }
 0x22b   :  { %v1349_v37 = vadd.f32 %v379_v34, %v332_v35 }
 0x22d   :  { %v418_v40 = vrot.slane %v1349_v37, 6  ;;  %v1096_v46 = vpack.i.bf16 %v1349_v37, %v383_v28  ;;  %v403_v49 = vrot.slane %v1349_v37, 4 }
 0x22f   :  { %v419_v41 = vsel %vm45_vm2, %v417_v33, %v418_v40  ;;  %v422_v1 = vsel %vm45_vm2, %v418_v40, %v415_v39  ;;  %v408_v53 = vsel %vm404_vm7, %v403_v49, %v400_v50  ;;  %v405_v13 = vsel %vm404_vm7, %v402_v0, %v403_v49 }
 0x230   :  { %v1091_v2 = vpack.i.bf16 %v419_v41, %v425_v42  ;;  %v423_v44 = vsel %vm50_vm3, %v422_v1, 0.0  ;;  %v411_v56 = vsel %vm409_vm8, %v408_v53, 0.0 }
 0x231   :  { %v1081_v45 = vpack.i.bf16 %v421_v43, %v423_v44 }
 0x232   :  { %1092 = vrot.lane.b32.xlu1 %v1091_v2, %s1129_s6 }
 0x233   :  { %1082 = vrot.lane.b32.xlu2 %v1081_v45, %s1129_s6 }
 0x23b   :  { %1097 = vrot.lane.b32.xlu2 %v1096_v46, %s1130_s7 }
 0x28d   :  { %v1083_v51 = vpop.permute.xlu2 %1082 }
 0x28e   :  { %v1085_v3 = vunpack.i.h.bf16 %v1083_v51  ;;  %v1084_v8 = vunpack.i.l.bf16 %v1083_v51 }
 0x290   :  { %v459_v59 = vsel %vm103_vm4, %v411_v56, %v1084_v8  ;;  %v460_v60 = vsel %vm103_vm4, %v407_v55, %v1085_v3  ;;  %v1030_v55 = vld [vmem:[%s1498_s1 + $0xa8] sm:$0xff]  ;;  %v1029_v56 = vld [vmem:[%s1498_s1 + $0xa0] sm:$0xff] }
 0x291   :  { %v1088_v54 = vpop.permute.xlu0 %1087 }
 0x292   :  { %v1090_v57 = vunpack.i.h.bf16 %v1088_v54  ;;  %v1089_v58 = vunpack.i.l.bf16 %v1088_v54  ;;  %v1031_v54 = vld [vmem:[%s1498_s1 + $0xb0] sm:$0xff] }
 0x293   :  { %666 = vmatpush.bf16.msrb.mxu2 %v1031_v54  ;;  %v1128_v54 = vld [vmem:[%s1499_s4 + $0x7] ss:$0 sm:$0xff] }
 0x294   :  { %v463_v61 = vsel %vm108_vm5, %v459_v59, %v1089_v58  ;;  %v464_v62 = vsel %vm108_vm5, %v460_v60, %v1090_v57  ;;  %v1028_v57 = vld [vmem:[%s1498_s1 + $0x98] sm:$0xff]  ;;  %v1027_v58 = vld [vmem:[%s1498_s1 + $0x90] sm:$0xff] }
 0x295   :  { %v467_v63 = vpack.c.bf16 %v464_v62, %v463_v61  ;;  %v1098_v5 = vpop.permute.xlu2 %1097 }
 0x296   :  { %v1100_v11 = vunpack.i.h.bf16 %v1098_v5  ;;  %v1099_v12 = vunpack.i.l.bf16 %v1098_v5 }
 0x297   :  { %928 = vmatmul.msk.bf16.vlgmr.msra.gmra.mxu3 %vm154_vm6, %v467_v63  ;;  %667 = vmatpush.bf16.msrb.mxu2 %v1030_v55 }
 0x29b   :  { %668 = vmatpush.bf16.msrb.mxu2 %v1029_v56 }
 0x29f   :  { %669 = vmatpush.bf16.msrb.mxu2 %v1028_v57 }
 0x2a3   :  { %670 = vmatpush.bf16.msrb.mxu2 %v1027_v58 }
 0x2a4   :  { %v1093_v7 = vpop.permute.xlu1 %1092 }
 0x2a5   :  { %v1095_v9 = vunpack.i.h.bf16 %v1093_v7  ;;  %v1094_v10 = vunpack.i.l.bf16 %v1093_v7 }
 0x2a7   :  { %v462_v15 = vsel %vm103_vm4, %v405_v13, %v1095_v9  ;;  %v461_v16 = vsel %vm103_vm4, %v413_v14, %v1094_v10 }
 0x2a8   :  { %v465_v17 = vsel %vm108_vm5, %v461_v16, %v1099_v12  ;;  %v466_v19 = vsel %vm108_vm5, %v462_v15, %v1100_v11 }
 0x2a9   :  { %v468_v20 = vpack.c.bf16 %v466_v19, %v465_v17 }
 0x2ab   :  { %929 = vmatmul.msk.bf16.gmra.mxu3 %vm154_vm6, %v468_v20 }
 0x31a   :  { %v523_v21 = vpop.f32.mrf.mxu3 }
 0x31b   :  { %v524_v23 = vadd.f32 %v1124_v22, %v523_v21 }
 0x31d   :  { %v533_v25 = vmax.f32 %v524_v23, 0.0 }
 0x31f   :  { %v552_v28 = vrot.slane %v533_v25, 4  ;;  %v564_v43 = vrot.slane %v533_v25, 6 }
 0x322   :  { %v525_v24 = vpop.f32.mrf.mxu3 }
 0x323   :  { %v526_v26 = vadd.f32 %v1124_v22, %v525_v24 }
 0x325   :  { %v534_v27 = vmax.f32 %v526_v26, 0.0 }
 0x327   :  { %v553_v29 = vrot.slane %v534_v27, 4  ;;  %v1106_v30 = vpack.i.bf16 %v534_v27, %v533_v25  ;;  %v565_v41 = vrot.slane %v534_v27, 6  ;;  %v1034_v25 = vld [vmem:[%s1501_s3 + $0x8] sm:$0xff]  ;;  %v1036_v27 = vld [vmem:[%s1501_s3 + $0x18] sm:$0xff] }
 0x328   :  { %723 = vmatpush.bf16.msrb.mxu0 %v1034_v25  ;;  %763 = vmatpush.bf16.msrb.mxu1 %v1036_v27 }
 0x329   :  { %1107 = vrot.lane.b32.xlu1 %v1106_v30, %s1130_s7  ;;  %v558_v32 = vsel %vm404_vm7, %v552_v28, %v553_v29  ;;  %v570_v52 = vsel %vm45_vm2, %v564_v43, %v565_v41  ;;  %v1125_v30 = vld [vmem:[%s1499_s4 + $0x3] ss:$0 sm:$0xff] }
 0x32c   :  { %724 = vmatpush.bf16.msrb.mxu0 %v1033_v4 }
 0x32e   :  { %v528_v33 = vpop.f32.mrf.mxu3 }
 0x32f   :  { %v529_v34 = vadd.f32 %v1124_v22, %v528_v33 }
 0x331   :  { %v535_v35 = vmax.f32 %v529_v34, 0.0 }
 0x333   :  { %v554_v36 = vrot.slane %v535_v35, 4  ;;  %v566_v38 = vrot.slane %v535_v35, 6 }
 0x335   :  { %v557_v39 = vsel %vm404_vm7, %v553_v29, %v554_v36  ;;  %v569_v2 = vsel %vm45_vm2, %v565_v41, %v566_v38  ;;  %v1035_v29 = vld [vmem:[%s1501_s3 + $0x10] sm:$0xff] }
 0x336   :  { %v530_v40 = vpop.f32.mrf.mxu3  ;;  %v574_v46 = vsel %vm50_vm3, %v569_v2, 0.0  ;;  %v562_v16 = vsel %vm409_vm8, %v557_v39, 0.0  ;;  %764 = vmatpush.bf16.msrb.mxu1 %v1035_v29 }
 0x337   :  { %v531_v42 = vadd.f32 %v1124_v22, %v530_v40 }
 0x339   :  { %v536_v1 = vmax.f32 %v531_v42, 0.0 }
 0x33b   :  { %v555_v44 = vrot.slane %v536_v1, 4  ;;  %v567_v45 = vrot.slane %v536_v1, 6  ;;  %v1116_v53 = vpack.i.bf16 %v536_v1, %v535_v35 }
 0x33d   :  { %v568_v47 = vsel %vm45_vm2, %v566_v38, %v567_v45  ;;  %v571_v48 = vsel %vm45_vm2, %v567_v45, %v564_v43  ;;  %v556_v49 = vsel %vm404_vm7, %v554_v36, %v555_v44  ;;  %v559_v50 = vsel %vm404_vm7, %v555_v44, %v552_v28  ;;  %v1038_v44 = vld [vmem:[%s1501_s3 + $0x28] sm:$0xff] }
 0x33e   :  { %v1111_v51 = vpack.i.bf16 %v568_v47, %v574_v46  ;;  %v572_v3 = vsel %vm50_vm3, %v571_v48, 0.0  ;;  %v560_v5 = vsel %vm409_vm8, %v559_v50, 0.0  ;;  %803 = vmatpush.bf16.msrb.mxu3 %v1038_v44  ;;  %v1127_v50 = vld [vmem:[%s1499_s4 + $0x6] ss:$0 sm:$0xff] }
 0x33f   :  { %v1101_v8 = vpack.i.bf16 %v570_v52, %v572_v3 }
 0x340   :  { %1112 = vrot.lane.b32.xlu2 %v1111_v51, %s1129_s6 }
 0x341   :  { %1102 = vrot.lane.b32.xlu0 %v1101_v8, %s1129_s6 }
 0x349   :  { %1117 = vrot.lane.b32.xlu0 %v1116_v53, %s1130_s7 }
 0x39a   :  { %v1113_v6 = vpop.permute.xlu2 %1112 }
 0x39b   :  { %v1108_v59 = vpop.permute.xlu1 %1107  ;;  %v1115_v13 = vunpack.i.h.bf16 %v1113_v6  ;;  %v1114_v14 = vunpack.i.l.bf16 %v1113_v6 }
 0x39c   :  { %v1110_v63 = vunpack.i.h.bf16 %v1108_v59  ;;  %v1109_v0 = vunpack.i.l.bf16 %v1108_v59 }
 0x39d   :  { %v611_v20 = vsel %vm103_vm4, %v556_v49, %v1115_v13  ;;  %v610_v21 = vsel %vm103_vm4, %v562_v16, %v1114_v14 }
 0x3b3   :  { %v1103_v60 = vpop.permute.xlu0 %1102 }
 0x3b4   :  { %v1105_v61 = vunpack.i.h.bf16 %v1103_v60  ;;  %v1104_v62 = vunpack.i.l.bf16 %v1103_v60 }
 0x3b6   :  { %v608_v7 = vsel %vm103_vm4, %v560_v5, %v1104_v62  ;;  %v609_v9 = vsel %vm103_vm4, %v558_v32, %v1105_v61 }
 0x3b7   :  { %v612_v10 = vsel %vm108_vm5, %v608_v7, %v1109_v0  ;;  %v613_v11 = vsel %vm108_vm5, %v609_v9, %v1110_v63 }
 0x3b8   :  { %v616_v12 = vpack.c.bf16 %v613_v11, %v612_v10 }
 0x3ba   :  { %967 = vmatmul.msk.bf16.vlgmr.msrb.gmra.mxu2 %vm154_vm6, %v616_v12 }
 0x3bb   :  { %v1118_v15 = vpop.permute.xlu0 %1117 }
 0x3bc   :  { %v1120_v17 = vunpack.i.h.bf16 %v1118_v15  ;;  %v1119_v19 = vunpack.i.l.bf16 %v1118_v15 }
 0x3be   :  { %v614_v22 = vsel %vm108_vm5, %v610_v21, %v1119_v19  ;;  %v615_v23 = vsel %vm108_vm5, %v611_v20, %v1120_v17 }
 0x3bf   :  { %v617_v24 = vpack.c.bf16 %v615_v23, %v614_v22 }
 0x3ca   :  { %968 = vmatmul.msk.bf16.gmra.mxu2 %vm154_vm6, %v617_v24 }
 0x43d   :  { %v672_v26 = vpop.f32.mrf.mxu2 }
 0x445   :  { %v673_v28 = vpop.f32.mrf.mxu2 }
 0x446   :  { %v674_v32 = vadd.f32 %v1125_v30, %v673_v28 }
 0x448   :  { %v680_v33 = vadd.f32 %v674_v32, %v1332_v18  ;;  %v1037_v18 = vld [vmem:[%s1501_s3 + $0x20] sm:$0xff] }
 0x449   :  { %804 = vmatpush.bf16.msrb.mxu3 %v1037_v18 }
 0x44a   :  { %v682_v35 = vpack.c.bf16 %v680_v33, %v680_v33 }
 0x44c   :  { %v695_v39 = vunpack.c.l.b16 %v682_v35 }
 0x44d   :  { %v676_v31 = vpop.f32.mrf.mxu2 }
 0x44e   :  { %v697_v42 = vrot.slane %v695_v39, 7 }
 0x455   :  { %v677_v34 = vpop.f32.mrf.mxu2 }
 0x456   :  { %v678_v36 = vadd.f32 %v1125_v30, %v677_v34 }
 0x458   :  { %v681_v38 = vadd.f32 %v678_v36, %v1349_v37  ;;  %v1126_v37 = vld [vmem:[%s1499_s4 + $0x5] ss:$0 sm:$0xff] }
 0x45a   :  { %v683_v40 = vpack.c.bf16 %v681_v38, %v681_v38 }
 0x45c   :  { %v696_v41 = vunpack.c.l.b16 %v683_v40 }
 0x45e   :  { %v698_v1 = vrot.slane %v696_v41, 6 }
 0x460   :  { %v700_v2 = vsel %vm699_vm9, %v698_v1, %v697_v42 }
 0x461   :  { %v701_v43 = vpack.c.b16 %v700_v2, %v700_v2 }
 0x463   :  { %978 = vmatmul.msk.bf16.vlgmr.msrb.gmra.mxu0 %vm103_vm4, %v701_v43 }
 0x4e0   :  { %v726_v45 = vpop.f32.mrf.mxu0 }
 0x4e1   :  { %v727_v46 = vadd.f32 %v1126_v37, %v726_v45 }
 0x4e3   :  { %v730_v47 = vmax.f32 %v727_v46, 0.0 }
 0x4e5   :  { %v731_v48 = vpack.c.bf16 %v730_v47, %v730_v47 }
 0x4e7   :  { %992 = vmatmul.msk.bf16.vlgmr.msrb.gmra.mxu1 %vm103_vm4, %v731_v48 }
 0x4e8   :  { %v728_v49 = vpop.f32.mrf.mxu0 }
 0x564   :  { %v766_v51 = vpop.f32.mrf.mxu1 }
 0x565   :  { %v767_v52 = vadd.f32 %v1127_v50, %v766_v51 }
 0x567   :  { %v770_v3 = vmax.f32 %v767_v52, 0.0 }
 0x569   :  { %v771_v8 = vpack.c.bf16 %v770_v3, %v770_v3 }
 0x56b   :  { %1006 = vmatmul.msk.bf16.vlgmr.msrb.gmra.mxu3 %vm103_vm4, %v771_v8 }
 0x56c   :  { %v768_v53 = vpop.f32.mrf.mxu1 }
 0x5ee   :  { %v806_v55 = vpop.f32.mrf.mxu3 }
 0x5ef   :  { %v807_v56 = vadd.f32 %v1128_v54, %v806_v55 }
 0x5f1   :  { %810 = vst [vmem:[%s1502_s5] sm:$0x3] %v807_v56 }
 0x5f6   :  { %v808_v57 = vpop.f32.mrf.mxu3 }

</bundles_post_ra>
